<compile_context>
chip_gen: v5e
topology: v5e:2x2
jax: 0.10.0
libtpu: 0.0.40
codegen_flags: <defaults>
</compile_context>

<pallas_src>
from functools import partial

import jax
import jax.numpy as jnp
from jax import lax
from jax.experimental import pallas as pl
from jax.experimental.pallas import tpu as pltpu


def bottleneck_kernel(x_ref, mask_ref, a1_ref, a2_ref, a3_ref,
                      b1_ref, b2_ref, b3_ref, o_ref, *, width, dilation):
    """One batch-block per grid step.  Lane-dense layout: (channels, L) with
    L = B_BLK * H * W (B_BLK images concatenated on the lane axis).

    x_ref    : (1, Cin, L)  f32   input (also the residual identity)
    mask_ref : (9, 1, L)    f32   per-tap halo mask (0 where the 3x3 tap falls
                                  outside the image / into a neighboring image)
    a1_ref   : (P, Cin)     bf16  BN1-folded conv1 weight
    a2_ref   : (9, P, P)    bf16  BN2-folded conv2 weight, one (P, P) per tap
    a3_ref   : (Cout, P)    bf16  BN3-folded conv3 weight
    b1_ref   : (P, 1)       f32   bn1 bias
    b2_ref   : (P, 1)       f32   bn2 bias
    b3_ref   : (Cout, 1)    f32   bn3 bias
    o_ref    : (1, Cout, L) f32   output
    """
    x = x_ref[0]                                                    # (Cin, L) f32
    L = x.shape[-1]
    P = a1_ref.shape[0]

    # conv1 (1x1) + bn1 + relu, applied once on the un-expanded activation.
    h1 = jnp.maximum(
        jnp.dot(a1_ref[...], x.astype(jnp.bfloat16),
                preferred_element_type=jnp.float32) + b1_ref[...], 0.0)  # (P, L)

    # conv2 (3x3, dilation d) as 9 accumulating per-tap matmuls on rolled,
    # halo-masked copies of h1.  Rolls use the XLU slot; masks are cheap VPU.
    h2 = jnp.zeros((P, L), jnp.float32)
    for t in range(9):
        dh = t // 3 - 1
        dw = t % 3 - 1
        off = dh * dilation * width + dw * dilation
        if off == 0:
            tap = h1                                  # center tap: no shift, mask == 1
        else:
            # tap[j] = h1[j + off] when in-bounds, else 0 (zero padding of conv2).
            tap = pltpu.roll(h1, shift=(-off) % L, axis=1) * mask_ref[t]
        h2 = h2 + jnp.dot(a2_ref[t], tap.astype(jnp.bfloat16),
                          preferred_element_type=jnp.float32)
    h2 = jnp.maximum(h2 + b2_ref[...], 0.0)                         # (P, L)

    # conv3 (1x1) + bn3.
    h3 = jnp.dot(a3_ref[...], h2.astype(jnp.bfloat16),
                 preferred_element_type=jnp.float32) + b3_ref[...]  # (Cout, L)

    # residual add (identity == x for stride=1 / downsample=None) + relu.
    o_ref[0] = jnp.maximum(h3 + x, 0.0)


def _fold_bn(bn, eps):
    g, b, m, v = bn
    s = g / jnp.sqrt(v + eps)
    return s, b - m * s


def bottleneck_forward(x_nchw, w1, w2, w3, bn1, bn2, bn3, dilation=1, eps=1e-5):
    """x_nchw: (N, Cin, H, W).  w1:(P,Cin)  w2:(P,P,3,3)  w3:(Cout,P) (PyTorch OI[HW]).
    bn* = (gamma, beta, running_mean, running_var).  stride=1, downsample=None."""
    x = x_nchw.astype(jnp.float32)
    N, Cin, H, W = x.shape
    P = w1.shape[0]
    Cout = w3.shape[0]
    assert Cout == Cin, "downsample=None requires inplanes == planes * expansion"
    M = H * W
    d = int(dilation)

    s1, c1 = _fold_bn(bn1, eps)
    s2, c2 = _fold_bn(bn2, eps)
    s3, c3 = _fold_bn(bn3, eps)

    # ---- batch blocking: concatenate B_BLK images on the lane axis so each
    #      grid step feeds the MXU >= ~512 lane columns per weight load. ----
    B_BLK = max(1, min(N, -(-512 // M)))
    if N % B_BLK != 0:
        B_BLK = 1
    NB = N // B_BLK
    L = B_BLK * M

    x_l = (x.reshape(N, Cin, M)
            .reshape(NB, B_BLK, Cin, M)
            .transpose(0, 2, 1, 3)
            .reshape(NB, Cin, L))                                   # (NB, Cin, L)

    # ---- per-tap halo mask (0 where the shifted tap leaves the image). ----
    hh = jnp.arange(H)
    ww = jnp.arange(W)
    masks = []
    for dh in range(3):
        for dw in range(3):
            oh = (dh - 1) * d
            ow = (dw - 1) * d
            mh = (hh + oh >= 0) & (hh + oh < H)
            mw = (ww + ow >= 0) & (ww + ow < W)
            masks.append((mh[:, None] & mw[None, :]).reshape(M))
    mask = jnp.stack(masks, axis=0).astype(jnp.float32)             # (9, M)
    mask = jnp.tile(mask, (1, B_BLK)).reshape(9, 1, L)              # (9, 1, L)

    # ---- BN-folded weights (bf16 MXU operands) and f32 biases. ----
    a1 = (s1[:, None] * w1).astype(jnp.bfloat16)                    # (P, Cin)
    w2f = s2[:, None, None, None] * w2                              # (P, P, 3, 3)
    a2 = jnp.transpose(w2f, (2, 3, 0, 1)).reshape(9, P, P).astype(jnp.bfloat16)
    a3 = (s3[:, None] * w3).astype(jnp.bfloat16)                    # (Cout, P)
    b1v = c1[:, None]                                               # (P, 1)
    b2v = c2[:, None]                                               # (P, 1)
    b3v = c3[:, None]                                               # (Cout, 1)

    # ---- cost estimate (real FLOPs, not inflated) and VMEM budget. ----
    flops = 2 * N * M * (P * Cin + 9 * P * P + Cout * P)
    bytes_accessed = (4 * N * Cin * M + 4 * N * Cout * M
                      + 2 * (P * Cin + 9 * P * P + Cout * P)
                      + 4 * (2 * P + Cout) + 4 * 9 * L)
    per_step_bytes = (4 * (Cin + Cout) * L + 4 * 9 * L
                      + 2 * (P * Cin + 9 * P * P + Cout * P)
                      + 4 * (2 * P + Cout))
    vmem_limit = int(min(max(6 * per_step_bytes, 32 * 1024 * 1024),
                         64 * 1024 * 1024))

    out = pl.pallas_call(
        partial(bottleneck_kernel, width=W, dilation=d),
        out_shape=jax.ShapeDtypeStruct((NB, Cout, L), jnp.float32),
        grid_spec=pltpu.PrefetchScalarGridSpec(
            num_scalar_prefetch=0,
            grid=(NB,),
            in_specs=[
                pl.BlockSpec((1, Cin, L), lambda n: (n, 0, 0)),
                pl.BlockSpec((9, 1, L),   lambda n: (0, 0, 0)),
                pl.BlockSpec((P, Cin),    lambda n: (0, 0)),
                pl.BlockSpec((9, P, P),   lambda n: (0, 0, 0)),
                pl.BlockSpec((Cout, P),   lambda n: (0, 0)),
                pl.BlockSpec((P, 1),      lambda n: (0, 0)),
                pl.BlockSpec((P, 1),      lambda n: (0, 0)),
                pl.BlockSpec((Cout, 1),   lambda n: (0, 0)),
            ],
            out_specs=pl.BlockSpec((1, Cout, L), lambda n: (n, 0, 0)),
        ),
        compiler_params=pltpu.CompilerParams(
            dimension_semantics=("parallel",),
            vmem_limit_bytes=vmem_limit),
        cost_estimate=pl.CostEstimate(flops=flops, transcendentals=0,
                                      bytes_accessed=bytes_accessed),
    )(x_l, mask, a1, a2, a3, b1v, b2v, b3v)

    out = (out.reshape(NB, Cout, B_BLK, M)
              .transpose(0, 2, 1, 3)
              .reshape(N, Cout, H, W))
    return out


def reference_nchw(x, w1, w2, w3, bn1, bn2, bn3, dilation=1, eps=1e-5):
    """Pure-JAX f32 reference (inference-mode BN) for verification."""
    def bn(o, p):
        g, b, m, v = p
        s = g / jnp.sqrt(v + eps)
        return (o - m[None, :, None, None]) * s[None, :, None, None] + b[None, :, None, None]
    dn = ('NCHW', 'OIHW', 'NCHW')
    d = int(dilation)
    o = lax.conv_general_dilated(x, w1[:, :, None, None], (1, 1), 'VALID',
                                 dimension_numbers=dn)
    o = jnp.maximum(bn(o, bn1), 0.0)
    o = lax.conv_general_dilated(o, w2, (1, 1), ((d, d), (d, d)),
                                 rhs_dilation=(d, d), dimension_numbers=dn)
    o = jnp.maximum(bn(o, bn2), 0.0)
    o = lax.conv_general_dilated(o, w3[:, :, None, None], (1, 1), 'VALID',
                                 dimension_numbers=dn)
    o = bn(o, bn3)
    return jnp.maximum(o + x, 0.0)


if __name__ == "__main__":
    key = jax.random.PRNGKey(0)
    ks = jax.random.split(key, 16)

    # Bottleneck(inplanes=16, planes=4, stride=1, dilation=1, downsample=None)
    N, planes, H, W = 2, 4, 16, 16
    Cin = planes * 4          # expansion = 4, identity shortcut requires inplanes == planes*4
    Cout = planes * 4

    x = jax.random.normal(ks[0], (N, Cin, H, W), jnp.float32)

    # conv weights in PyTorch layouts (bias=False): 1x1 as (out,in), 3x3 as (out,in,3,3)
    w1 = 0.1 * jax.random.normal(ks[1], (planes, Cin), jnp.float32)
    w2 = 0.1 * jax.random.normal(ks[2], (planes, planes, 3, 3), jnp.float32)
    w3 = 0.1 * jax.random.normal(ks[3], (Cout, planes), jnp.float32)

    def make_bn(c, k0, k1, k2, k3):
        return (1.0 + 0.1 * jax.random.normal(k0, (c,), jnp.float32),     # gamma
                0.1 * jax.random.normal(k1, (c,), jnp.float32),           # beta
                0.1 * jax.random.normal(k2, (c,), jnp.float32),           # running_mean
                0.5 + jnp.abs(jax.random.normal(k3, (c,), jnp.float32)))  # running_var

    bn1 = make_bn(planes, ks[4], ks[5], ks[6], ks[7])
    bn2 = make_bn(planes, ks[8], ks[9], ks[10], ks[11])
    bn3 = make_bn(Cout, ks[12], ks[13], ks[14], ks[15])

    out = bottleneck_forward(x, w1, w2, w3, bn1, bn2, bn3)
    out = jax.block_until_ready(out)

    ref = jax.block_until_ready(reference_nchw(x, w1, w2, w3, bn1, bn2, bn3))
    assert out.shape == (N, Cout, H, W)
    # bf16 MXU operands (f32 accumulation / biases / residual) -> relaxed tolerance.
    assert jnp.max(jnp.abs(out - ref)) < 5e-2

    print("KERNEL_OK")
</pallas_src>

<mosaic_0001>
module attributes {stable_mosaic.version = 11 : i64} {
  func.func @bottleneck_kernel(%arg0: i32, %arg1: memref<1x16x512xf32, #tpu.memory_space<vmem>>, %arg2: memref<9x1x512xf32, #tpu.memory_space<vmem>>, %arg3: memref<4x16xbf16, #tpu.memory_space<vmem>>, %arg4: memref<9x4x4xbf16, #tpu.memory_space<vmem>>, %arg5: memref<16x4xbf16, #tpu.memory_space<vmem>>, %arg6: memref<4x1xf32, #tpu.memory_space<vmem>>, %arg7: memref<4x1xf32, #tpu.memory_space<vmem>>, %arg8: memref<16x1xf32, #tpu.memory_space<vmem>>, %arg9: memref<1x16x512xf32, #tpu.memory_space<vmem>>) attributes {dimension_semantics = [#tpu.dimension_semantics<parallel>], iteration_bounds = array<i64: 1>, scalar_prefetch = 0 : i64, scratch_operands = 0 : i64, tpu.core_type = #tpu.core_type<tc>, window_params = [{transform_indices = @transform_0, window_bounds = array<i64: 1, 16, 512>}, {pipeline_mode = #tpu.pipeline_mode<synchronous>, transform_indices = @transform_1, window_bounds = array<i64: 9, 1, 512>}, {pipeline_mode = #tpu.pipeline_mode<synchronous>, transform_indices = @transform_2, window_bounds = array<i64: 4, 16>}, {pipeline_mode = #tpu.pipeline_mode<synchronous>, transform_indices = @transform_3, window_bounds = array<i64: 9, 4, 4>}, {pipeline_mode = #tpu.pipeline_mode<synchronous>, transform_indices = @transform_4, window_bounds = array<i64: 16, 4>}, {pipeline_mode = #tpu.pipeline_mode<synchronous>, transform_indices = @transform_5, window_bounds = array<i64: 4, 1>}, {pipeline_mode = #tpu.pipeline_mode<synchronous>, transform_indices = @transform_6, window_bounds = array<i64: 4, 1>}, {pipeline_mode = #tpu.pipeline_mode<synchronous>, transform_indices = @transform_7, window_bounds = array<i64: 16, 1>}, {transform_indices = @transform_8, window_bounds = array<i64: 1, 16, 512>}]} {
    %c0 = arith.constant 0 : index
    %c0_0 = arith.constant 0 : index
    %c0_1 = arith.constant 0 : index
    %0 = vector.load %arg1[%c0, %c0_0, %c0_1] : memref<1x16x512xf32, #tpu.memory_space<vmem>>, vector<1x16x512xf32>
    %1 = vector.shape_cast %0 : vector<1x16x512xf32> to vector<16x512xf32>
    %c0_2 = arith.constant 0 : index
    %c0_3 = arith.constant 0 : index
    %2 = vector.load %arg3[%c0_2, %c0_3] : memref<4x16xbf16, #tpu.memory_space<vmem>>, vector<4x16xbf16>
    %3 = arith.truncf %1 : vector<16x512xf32> to vector<16x512xbf16>
    %cst = arith.constant dense<0.000000e+00> : vector<4x512xf32>
    %4 = tpu.matmul %2, %3, %cst {dimension_numbers = #tpu.dot_dimension_numbers<[1], [0], [0], [1], [0, 0, 1, 1], [], []>} : vector<4x16xbf16>, vector<16x512xbf16>, vector<4x512xf32> -> vector<4x512xf32>
    %c0_4 = arith.constant 0 : index
    %c0_5 = arith.constant 0 : index
    %5 = vector.load %arg6[%c0_4, %c0_5] : memref<4x1xf32, #tpu.memory_space<vmem>>, vector<4x1xf32>
    %6 = vector.broadcast %5 : vector<4x1xf32> to vector<4x512xf32>
    %7 = arith.addf %4, %6 : vector<4x512xf32>
    %cst_6 = arith.constant 0.000000e+00 : f32
    %8 = vector.broadcast %cst_6 : f32 to vector<4x512xf32>
    %9 = arith.maximumf %7, %8 : vector<4x512xf32>
    %cst_7 = arith.constant 0.000000e+00 : f32
    %10 = vector.broadcast %cst_7 : f32 to vector<4x512xf32>
    %c17_i32 = arith.constant 17 : i32
    %11 = tpu.dynamic_rotate %9 by %c17_i32 dim 1 : vector<4x512xf32>, i32 -> vector<4x512xf32>
    %c0_8 = arith.constant 0 : index
    %c0_9 = arith.constant 0 : index
    %c0_10 = arith.constant 0 : index
    %12 = vector.load %arg2[%c0_8, %c0_9, %c0_10] : memref<9x1x512xf32, #tpu.memory_space<vmem>>, vector<1x1x512xf32>
    %13 = vector.shape_cast %12 : vector<1x1x512xf32> to vector<1x512xf32>
    %14 = vector.broadcast %13 : vector<1x512xf32> to vector<4x512xf32>
    %15 = arith.mulf %11, %14 : vector<4x512xf32>
    %c0_11 = arith.constant 0 : index
    %c0_12 = arith.constant 0 : index
    %c0_13 = arith.constant 0 : index
    %16 = vector.load %arg4[%c0_11, %c0_12, %c0_13] : memref<9x4x4xbf16, #tpu.memory_space<vmem>>, vector<1x4x4xbf16>
    %17 = vector.shape_cast %16 : vector<1x4x4xbf16> to vector<4x4xbf16>
    %18 = arith.truncf %15 : vector<4x512xf32> to vector<4x512xbf16>
    %cst_14 = arith.constant dense<0.000000e+00> : vector<4x512xf32>
    %19 = tpu.matmul %17, %18, %cst_14 {dimension_numbers = #tpu.dot_dimension_numbers<[1], [0], [0], [1], [0, 0, 1, 1], [], []>} : vector<4x4xbf16>, vector<4x512xbf16>, vector<4x512xf32> -> vector<4x512xf32>
    %20 = arith.addf %10, %19 : vector<4x512xf32>
    %c16_i32 = arith.constant 16 : i32
    %21 = tpu.dynamic_rotate %9 by %c16_i32 dim 1 : vector<4x512xf32>, i32 -> vector<4x512xf32>
    %c1 = arith.constant 1 : index
    %c0_15 = arith.constant 0 : index
    %c0_16 = arith.constant 0 : index
    %22 = vector.load %arg2[%c1, %c0_15, %c0_16] : memref<9x1x512xf32, #tpu.memory_space<vmem>>, vector<1x1x512xf32>
    %23 = vector.shape_cast %22 : vector<1x1x512xf32> to vector<1x512xf32>
    %24 = vector.broadcast %23 : vector<1x512xf32> to vector<4x512xf32>
    %25 = arith.mulf %21, %24 : vector<4x512xf32>
    %c1_17 = arith.constant 1 : index
    %c0_18 = arith.constant 0 : index
    %c0_19 = arith.constant 0 : index
    %26 = vector.load %arg4[%c1_17, %c0_18, %c0_19] : memref<9x4x4xbf16, #tpu.memory_space<vmem>>, vector<1x4x4xbf16>
    %27 = vector.shape_cast %26 : vector<1x4x4xbf16> to vector<4x4xbf16>
    %28 = arith.truncf %25 : vector<4x512xf32> to vector<4x512xbf16>
    %cst_20 = arith.constant dense<0.000000e+00> : vector<4x512xf32>
    %29 = tpu.matmul %27, %28, %cst_20 {dimension_numbers = #tpu.dot_dimension_numbers<[1], [0], [0], [1], [0, 0, 1, 1], [], []>} : vector<4x4xbf16>, vector<4x512xbf16>, vector<4x512xf32> -> vector<4x512xf32>
    %30 = arith.addf %20, %29 : vector<4x512xf32>
    %c15_i32 = arith.constant 15 : i32
    %31 = tpu.dynamic_rotate %9 by %c15_i32 dim 1 : vector<4x512xf32>, i32 -> vector<4x512xf32>
    %c2 = arith.constant 2 : index
    %c0_21 = arith.constant 0 : index
    %c0_22 = arith.constant 0 : index
    %32 = vector.load %arg2[%c2, %c0_21, %c0_22] : memref<9x1x512xf32, #tpu.memory_space<vmem>>, vector<1x1x512xf32>
    %33 = vector.shape_cast %32 : vector<1x1x512xf32> to vector<1x512xf32>
    %34 = vector.broadcast %33 : vector<1x512xf32> to vector<4x512xf32>
    %35 = arith.mulf %31, %34 : vector<4x512xf32>
    %c2_23 = arith.constant 2 : index
    %c0_24 = arith.constant 0 : index
    %c0_25 = arith.constant 0 : index
    %36 = vector.load %arg4[%c2_23, %c0_24, %c0_25] : memref<9x4x4xbf16, #tpu.memory_space<vmem>>, vector<1x4x4xbf16>
    %37 = vector.shape_cast %36 : vector<1x4x4xbf16> to vector<4x4xbf16>
    %38 = arith.truncf %35 : vector<4x512xf32> to vector<4x512xbf16>
    %cst_26 = arith.constant dense<0.000000e+00> : vector<4x512xf32>
    %39 = tpu.matmul %37, %38, %cst_26 {dimension_numbers = #tpu.dot_dimension_numbers<[1], [0], [0], [1], [0, 0, 1, 1], [], []>} : vector<4x4xbf16>, vector<4x512xbf16>, vector<4x512xf32> -> vector<4x512xf32>
    %40 = arith.addf %30, %39 : vector<4x512xf32>
    %c1_i32 = arith.constant 1 : i32
    %41 = tpu.dynamic_rotate %9 by %c1_i32 dim 1 : vector<4x512xf32>, i32 -> vector<4x512xf32>
    %c3 = arith.constant 3 : index
    %c0_27 = arith.constant 0 : index
    %c0_28 = arith.constant 0 : index
    %42 = vector.load %arg2[%c3, %c0_27, %c0_28] : memref<9x1x512xf32, #tpu.memory_space<vmem>>, vector<1x1x512xf32>
    %43 = vector.shape_cast %42 : vector<1x1x512xf32> to vector<1x512xf32>
    %44 = vector.broadcast %43 : vector<1x512xf32> to vector<4x512xf32>
    %45 = arith.mulf %41, %44 : vector<4x512xf32>
    %c3_29 = arith.constant 3 : index
    %c0_30 = arith.constant 0 : index
    %c0_31 = arith.constant 0 : index
    %46 = vector.load %arg4[%c3_29, %c0_30, %c0_31] : memref<9x4x4xbf16, #tpu.memory_space<vmem>>, vector<1x4x4xbf16>
    %47 = vector.shape_cast %46 : vector<1x4x4xbf16> to vector<4x4xbf16>
    %48 = arith.truncf %45 : vector<4x512xf32> to vector<4x512xbf16>
    %cst_32 = arith.constant dense<0.000000e+00> : vector<4x512xf32>
    %49 = tpu.matmul %47, %48, %cst_32 {dimension_numbers = #tpu.dot_dimension_numbers<[1], [0], [0], [1], [0, 0, 1, 1], [], []>} : vector<4x4xbf16>, vector<4x512xbf16>, vector<4x512xf32> -> vector<4x512xf32>
    %50 = arith.addf %40, %49 : vector<4x512xf32>
    %c4 = arith.constant 4 : index
    %c0_33 = arith.constant 0 : index
    %c0_34 = arith.constant 0 : index
    %51 = vector.load %arg4[%c4, %c0_33, %c0_34] : memref<9x4x4xbf16, #tpu.memory_space<vmem>>, vector<1x4x4xbf16>
    %52 = vector.shape_cast %51 : vector<1x4x4xbf16> to vector<4x4xbf16>
    %53 = arith.truncf %9 : vector<4x512xf32> to vector<4x512xbf16>
    %cst_35 = arith.constant dense<0.000000e+00> : vector<4x512xf32>
    %54 = tpu.matmul %52, %53, %cst_35 {dimension_numbers = #tpu.dot_dimension_numbers<[1], [0], [0], [1], [0, 0, 1, 1], [], []>} : vector<4x4xbf16>, vector<4x512xbf16>, vector<4x512xf32> -> vector<4x512xf32>
    %55 = arith.addf %50, %54 : vector<4x512xf32>
    %c511_i32 = arith.constant 511 : i32
    %56 = tpu.dynamic_rotate %9 by %c511_i32 dim 1 : vector<4x512xf32>, i32 -> vector<4x512xf32>
    %c5 = arith.constant 5 : index
    %c0_36 = arith.constant 0 : index
    %c0_37 = arith.constant 0 : index
    %57 = vector.load %arg2[%c5, %c0_36, %c0_37] : memref<9x1x512xf32, #tpu.memory_space<vmem>>, vector<1x1x512xf32>
    %58 = vector.shape_cast %57 : vector<1x1x512xf32> to vector<1x512xf32>
    %59 = vector.broadcast %58 : vector<1x512xf32> to vector<4x512xf32>
    %60 = arith.mulf %56, %59 : vector<4x512xf32>
    %c5_38 = arith.constant 5 : index
    %c0_39 = arith.constant 0 : index
    %c0_40 = arith.constant 0 : index
    %61 = vector.load %arg4[%c5_38, %c0_39, %c0_40] : memref<9x4x4xbf16, #tpu.memory_space<vmem>>, vector<1x4x4xbf16>
    %62 = vector.shape_cast %61 : vector<1x4x4xbf16> to vector<4x4xbf16>
    %63 = arith.truncf %60 : vector<4x512xf32> to vector<4x512xbf16>
    %cst_41 = arith.constant dense<0.000000e+00> : vector<4x512xf32>
    %64 = tpu.matmul %62, %63, %cst_41 {dimension_numbers = #tpu.dot_dimension_numbers<[1], [0], [0], [1], [0, 0, 1, 1], [], []>} : vector<4x4xbf16>, vector<4x512xbf16>, vector<4x512xf32> -> vector<4x512xf32>
    %65 = arith.addf %55, %64 : vector<4x512xf32>
    %c497_i32 = arith.constant 497 : i32
    %66 = tpu.dynamic_rotate %9 by %c497_i32 dim 1 : vector<4x512xf32>, i32 -> vector<4x512xf32>
    %c6 = arith.constant 6 : index
    %c0_42 = arith.constant 0 : index
    %c0_43 = arith.constant 0 : index
    %67 = vector.load %arg2[%c6, %c0_42, %c0_43] : memref<9x1x512xf32, #tpu.memory_space<vmem>>, vector<1x1x512xf32>
    %68 = vector.shape_cast %67 : vector<1x1x512xf32> to vector<1x512xf32>
    %69 = vector.broadcast %68 : vector<1x512xf32> to vector<4x512xf32>
    %70 = arith.mulf %66, %69 : vector<4x512xf32>
    %c6_44 = arith.constant 6 : index
    %c0_45 = arith.constant 0 : index
    %c0_46 = arith.constant 0 : index
    %71 = vector.load %arg4[%c6_44, %c0_45, %c0_46] : memref<9x4x4xbf16, #tpu.memory_space<vmem>>, vector<1x4x4xbf16>
    %72 = vector.shape_cast %71 : vector<1x4x4xbf16> to vector<4x4xbf16>
    %73 = arith.truncf %70 : vector<4x512xf32> to vector<4x512xbf16>
    %cst_47 = arith.constant dense<0.000000e+00> : vector<4x512xf32>
    %74 = tpu.matmul %72, %73, %cst_47 {dimension_numbers = #tpu.dot_dimension_numbers<[1], [0], [0], [1], [0, 0, 1, 1], [], []>} : vector<4x4xbf16>, vector<4x512xbf16>, vector<4x512xf32> -> vector<4x512xf32>
    %75 = arith.addf %65, %74 : vector<4x512xf32>
    %c496_i32 = arith.constant 496 : i32
    %76 = tpu.dynamic_rotate %9 by %c496_i32 dim 1 : vector<4x512xf32>, i32 -> vector<4x512xf32>
    %c7 = arith.constant 7 : index
    %c0_48 = arith.constant 0 : index
    %c0_49 = arith.constant 0 : index
    %77 = vector.load %arg2[%c7, %c0_48, %c0_49] : memref<9x1x512xf32, #tpu.memory_space<vmem>>, vector<1x1x512xf32>
    %78 = vector.shape_cast %77 : vector<1x1x512xf32> to vector<1x512xf32>
    %79 = vector.broadcast %78 : vector<1x512xf32> to vector<4x512xf32>
    %80 = arith.mulf %76, %79 : vector<4x512xf32>
    %c7_50 = arith.constant 7 : index
    %c0_51 = arith.constant 0 : index
    %c0_52 = arith.constant 0 : index
    %81 = vector.load %arg4[%c7_50, %c0_51, %c0_52] : memref<9x4x4xbf16, #tpu.memory_space<vmem>>, vector<1x4x4xbf16>
    %82 = vector.shape_cast %81 : vector<1x4x4xbf16> to vector<4x4xbf16>
    %83 = arith.truncf %80 : vector<4x512xf32> to vector<4x512xbf16>
    %cst_53 = arith.constant dense<0.000000e+00> : vector<4x512xf32>
    %84 = tpu.matmul %82, %83, %cst_53 {dimension_numbers = #tpu.dot_dimension_numbers<[1], [0], [0], [1], [0, 0, 1, 1], [], []>} : vector<4x4xbf16>, vector<4x512xbf16>, vector<4x512xf32> -> vector<4x512xf32>
    %85 = arith.addf %75, %84 : vector<4x512xf32>
    %c495_i32 = arith.constant 495 : i32
    %86 = tpu.dynamic_rotate %9 by %c495_i32 dim 1 : vector<4x512xf32>, i32 -> vector<4x512xf32>
    %c8 = arith.constant 8 : index
    %c0_54 = arith.constant 0 : index
    %c0_55 = arith.constant 0 : index
    %87 = vector.load %arg2[%c8, %c0_54, %c0_55] : memref<9x1x512xf32, #tpu.memory_space<vmem>>, vector<1x1x512xf32>
    %88 = vector.shape_cast %87 : vector<1x1x512xf32> to vector<1x512xf32>
    %89 = vector.broadcast %88 : vector<1x512xf32> to vector<4x512xf32>
    %90 = arith.mulf %86, %89 : vector<4x512xf32>
    %c8_56 = arith.constant 8 : index
    %c0_57 = arith.constant 0 : index
    %c0_58 = arith.constant 0 : index
    %91 = vector.load %arg4[%c8_56, %c0_57, %c0_58] : memref<9x4x4xbf16, #tpu.memory_space<vmem>>, vector<1x4x4xbf16>
    %92 = vector.shape_cast %91 : vector<1x4x4xbf16> to vector<4x4xbf16>
    %93 = arith.truncf %90 : vector<4x512xf32> to vector<4x512xbf16>
    %cst_59 = arith.constant dense<0.000000e+00> : vector<4x512xf32>
    %94 = tpu.matmul %92, %93, %cst_59 {dimension_numbers = #tpu.dot_dimension_numbers<[1], [0], [0], [1], [0, 0, 1, 1], [], []>} : vector<4x4xbf16>, vector<4x512xbf16>, vector<4x512xf32> -> vector<4x512xf32>
    %95 = arith.addf %85, %94 : vector<4x512xf32>
    %c0_60 = arith.constant 0 : index
    %c0_61 = arith.constant 0 : index
    %96 = vector.load %arg7[%c0_60, %c0_61] : memref<4x1xf32, #tpu.memory_space<vmem>>, vector<4x1xf32>
    %97 = vector.broadcast %96 : vector<4x1xf32> to vector<4x512xf32>
    %98 = arith.addf %95, %97 : vector<4x512xf32>
    %cst_62 = arith.constant 0.000000e+00 : f32
    %99 = vector.broadcast %cst_62 : f32 to vector<4x512xf32>
    %100 = arith.maximumf %98, %99 : vector<4x512xf32>
    %c0_63 = arith.constant 0 : index
    %c0_64 = arith.constant 0 : index
    %101 = vector.load %arg5[%c0_63, %c0_64] : memref<16x4xbf16, #tpu.memory_space<vmem>>, vector<16x4xbf16>
    %102 = arith.truncf %100 : vector<4x512xf32> to vector<4x512xbf16>
    %cst_65 = arith.constant dense<0.000000e+00> : vector<16x512xf32>
    %103 = tpu.matmul %101, %102, %cst_65 {dimension_numbers = #tpu.dot_dimension_numbers<[1], [0], [0], [1], [0, 0, 1, 1], [], []>} : vector<16x4xbf16>, vector<4x512xbf16>, vector<16x512xf32> -> vector<16x512xf32>
    %c0_66 = arith.constant 0 : index
    %c0_67 = arith.constant 0 : index
    %104 = vector.load %arg8[%c0_66, %c0_67] : memref<16x1xf32, #tpu.memory_space<vmem>>, vector<16x1xf32>
    %105 = vector.broadcast %104 : vector<16x1xf32> to vector<16x512xf32>
    %106 = arith.addf %103, %105 : vector<16x512xf32>
    %107 = arith.addf %106, %1 : vector<16x512xf32>
    %cst_68 = arith.constant 0.000000e+00 : f32
    %108 = vector.broadcast %cst_68 : f32 to vector<16x512xf32>
    %109 = arith.maximumf %107, %108 : vector<16x512xf32>
    %c0_69 = arith.constant 0 : index
    %c0_70 = arith.constant 0 : index
    %c0_71 = arith.constant 0 : index
    %110 = vector.load %arg9[%c0_69, %c0_70, %c0_71] : memref<1x16x512xf32, #tpu.memory_space<vmem>>, vector<1x16x512xf32>
    %111 = vector.shape_cast %110 : vector<1x16x512xf32> to vector<16x512xf32>
    %112 = vector.shape_cast %109 : vector<16x512xf32> to vector<1x16x512xf32>
    tpu.vector_store %arg9[%c0_69, %c0_70, %c0_71], %112 {strides = array<i32>} : memref<1x16x512xf32, #tpu.memory_space<vmem>>, vector<1x16x512xf32>,
    return
  }
  func.func @transform_0(%arg0: i32) -> (i32, i32, i32) {
    %c0_i32 = arith.constant 0 : i32
    %c0_i32_0 = arith.constant 0 : i32
    %c0_i32_1 = arith.constant 0 : i32
    return %arg0, %c0_i32, %c0_i32_0 : i32, i32, i32
  }
  func.func @transform_1(%arg0: i32) -> (i32, i32, i32) {
    %c0_i32 = arith.constant 0 : i32
    %c0_i32_0 = arith.constant 0 : i32
    %c0_i32_1 = arith.constant 0 : i32
    %c0_i32_2 = arith.constant 0 : i32
    return %c0_i32, %c0_i32_0, %c0_i32_1 : i32, i32, i32
  }
  func.func @transform_2(%arg0: i32) -> (i32, i32) {
    %c0_i32 = arith.constant 0 : i32
    %c0_i32_0 = arith.constant 0 : i32
    %c0_i32_1 = arith.constant 0 : i32
    return %c0_i32, %c0_i32_0 : i32, i32
  }
  func.func @transform_3(%arg0: i32) -> (i32, i32, i32) {
    %c0_i32 = arith.constant 0 : i32
    %c0_i32_0 = arith.constant 0 : i32
    %c0_i32_1 = arith.constant 0 : i32
    %c0_i32_2 = arith.constant 0 : i32
    return %c0_i32, %c0_i32_0, %c0_i32_1 : i32, i32, i32
  }
  func.func @transform_4(%arg0: i32) -> (i32, i32) {
    %c0_i32 = arith.constant 0 : i32
    %c0_i32_0 = arith.constant 0 : i32
    %c0_i32_1 = arith.constant 0 : i32
    return %c0_i32, %c0_i32_0 : i32, i32
  }
  func.func @transform_5(%arg0: i32) -> (i32, i32) {
    %c0_i32 = arith.constant 0 : i32
    %c0_i32_0 = arith.constant 0 : i32
    %c0_i32_1 = arith.constant 0 : i32
    return %c0_i32, %c0_i32_0 : i32, i32
  }
  func.func @transform_6(%arg0: i32) -> (i32, i32) {
    %c0_i32 = arith.constant 0 : i32
    %c0_i32_0 = arith.constant 0 : i32
    %c0_i32_1 = arith.constant 0 : i32
    return %c0_i32, %c0_i32_0 : i32, i32
  }
  func.func @transform_7(%arg0: i32) -> (i32, i32) {
    %c0_i32 = arith.constant 0 : i32
    %c0_i32_0 = arith.constant 0 : i32
    %c0_i32_1 = arith.constant 0 : i32
    return %c0_i32, %c0_i32_0 : i32, i32
  }
  func.func @transform_8(%arg0: i32) -> (i32, i32, i32) {
    %c0_i32 = arith.constant 0 : i32
    %c0_i32_0 = arith.constant 0 : i32
    %c0_i32_1 = arith.constant 0 : i32
    return %arg0, %c0_i32, %c0_i32_0 : i32, i32, i32
  }
}

</mosaic_0001>

<bundles_post_ra>
// kernel: tpu_custom_call.1
= control target key start
LH: loop header
LB: loop body
LE: loop exit
PB: predicated region body
PF: predicated region fallthrough
CT: control target
= control target key end

     0   :  { %13 = vsyncpa [#allocation3], 0  ;;  %s1683_s0 = inlined_call_operand.hbm [shape: f32[1,16,512], index: 0, kind: input, shape index: {}]   ;;  %s1684_s1 = inlined_call_operand.vmem [shape: f32[9,1,512], index: 1, kind: input, shape index: {}]   ;;  %s1685_s2 = inlined_call_operand.vmem [shape: bf16[4,16], index: 2, kind: input, shape index: {}]   ;;  %s1686_s3 = inlined_call_operand.vmem [shape: bf16[9,4,4], index: 3, kind: input, shape index: {}]   ;;  %s1687_s4 = inlined_call_operand.vmem [shape: bf16[16,4], index: 4, kind: input, shape index: {}]   ;;  %s1688_s5 = inlined_call_operand.vmem [shape: f32[4,1], index: 5, kind: input, shape index: {}]   ;;  %s1689_s6 = inlined_call_operand.vmem [shape: f32[4,1], index: 6, kind: input, shape index: {}]   ;;  %s1690_s7 = inlined_call_operand.vmem [shape: f32[16,1], index: 7, kind: input, shape index: {}]   ;;  %s1691_s8 = inlined_call_operand.hbm [shape: f32[1,16,512], index: 8, kind: output, shape index: {}]  }
   0x1   :  { %14 = vsyncpa [#allocation4], 0  ;;  %s19_s29 = sshll.u32 %s1683_s0, 4  ;;  %s1328_s30 = smov [#allocation2]   ;;  %s20_s29 = int_to_ptr.hbm [resolvable:$true] %s19_s29 }
   0x2   :  { %s21_s9 = sshll.u32 %s1328_s30, 4  ;;  %s1329_s10 = smov 512   ;;  %s22_s9 = int_to_ptr.vmem [resolvable:$true] %s21_s9 }
   0x3   :  { %s1330_s11 = smov 32  }
   0x4   :  { %27 = dma.hbm_to_vmem [thread:$0]  %s20_s29, 1024, %s22_s9, [#allocation3], %s1329_s10, %s1329_s10, %s1330_s11  }
   0x5   :  { %1324 = dma.done.wait [#allocation3], 1024  }
   0x6   :  { %1325 = vsyncadd [#allocation3], 4294966272  ;;  %v1331_v0 = vmov 0   ;;  %v47_v1 = vld [vmem:[#allocation2] sm:$0xff]  ;;  %v48_v3 = vld [vmem:[#allocation2 + $0x8] sm:$0xff]  ;;  %vm66_vm0 = vcmask 130048   ;;  %v134_v35 = vlaneseq }
   0x7   :  { %1265 = vset.pattern.permute.xlu0 %v1331_v0  ;;  %1266 = vset.pattern.permute.xlu1 %v1331_v0  ;;  %v51_v2 = vld [vmem:[#allocation2 + $0x20] sm:$0xff]  ;;  %v52_v5 = vld [vmem:[#allocation2 + $0x28] sm:$0xff]  ;;  %v49_v6 = vld [vmem:[#allocation2 + $0x10] sm:$0xff]  ;;  %s1334_s15 = smov 15   ;;  %s1335_s16 = smov 1   ;;  %vm198_vm3 = vcmask 1041408  }
   0x8   :  { %1267 = vset.pattern.permute.xlu2 %v1331_v0  ;;  %v56_v4 = vpack.c.bf16 %v51_v2, %v47_v1  ;;  %v53_v7 = vld [vmem:[#allocation2 + $0x30] sm:$0xff]  ;;  %v57_v8 = vpack.c.bf16 %v52_v5, %v48_v3  ;;  %v50_v10 = vld [vmem:[#allocation2 + $0x18] sm:$0xff]  ;;  %v55_v13 = vld [vmem:[%s1685_s2] sm:$0x3]  ;;  %s1332_s2 = smov 16   ;;  %s1336_s17 = smov 127  }
   0x9   :  { %v58_v9 = vpack.c.bf16 %v53_v7, %v49_v6  ;;  %v54_v11 = vld [vmem:[#allocation2 + $0x38] sm:$0xff]  ;;  %v60_v14 = vld [vmem:[%s1688_s5] sm:$0xf]  ;;  %s1333_s5 = smov 17   ;;  %s1337_s18 = smov 113   ;;  %v1441_v36 = vand.u32 127, %v134_v35 }
   0xa   :  { %77 = vmatpush.bf16.msra.mxu0 %v56_v4  ;;  %v59_v12 = vpack.c.bf16 %v54_v11, %v50_v10  ;;  %90 = vmatpush.bf16.msra.mxu1 %v57_v8  ;;  %s1338_s19 = smov 112   ;;  %s1339_s20 = smov 111   ;;  %v1037_v32 = vld [vmem:[%s1689_s6] sm:$0xf]  ;;  %v1192_v40 = vld [vmem:[%s1684_s1 + $0x4] sm:$0xf] }
   0xb   :  { %103 = vmatpush.bf16.msra.mxu2 %v58_v9  ;;  %63 = vperm.xlu0 %1265, %v60_v14   ;;  %v1446_v37 = vld [vmem:[%s1684_s1] sm:$0xf]  ;;  %vm136_vm1 = vcmp.lt.s32.totalorder %v1441_v36, 17  ;;  %vm168_vm2 = vcmp.lt.s32.totalorder %v1441_v36, 16  ;;  %v177_v42 = vperm.slane %v1192_v40, 1  ;;  %v178_v48 = vperm.slane %v1192_v40, 2 }
   0xc   :  { %116 = vmatpush.bf16.msra.mxu3 %v59_v12  ;;  %v144_v39 = vperm.slane %v1446_v37, 1  ;;  %v145_v52 = vperm.slane %v1446_v37, 2  ;;  %v1193_v55 = vld [vmem:[%s1686_s3 + $0x2] sm:$0x3]  ;;  %vm194_vm4 = vcmask 31744   ;;  %v176_v63 = vperm.slane %v1192_v40, 0 }
   0xd   :  { %1188 = vmatmul.msk.bf16.vlgmr.msra.gmra.mxu0 %vm66_vm0, %v55_v13  ;;  %1189 = vmatmul.msk.bf16.vlgmr.msra.gmra.mxu1 %vm66_vm0, %v55_v13  ;;  %v179_v0 = vperm.slane %v1192_v40, 3  ;;  %v1202_v11 = vld [vmem:[%s1684_s1 + $0x8] sm:$0xf]  ;;  %v143_v14 = vperm.slane %v1446_v37, 0  ;;  %vm338_vm5 = vcmp.lt.s32.totalorder %v1441_v36, 15  ;;  %vm443_vm6 = vcmp.lt.s32.totalorder %v1441_v36, 1 }
   0xe   :  { %1190 = vmatmul.msk.bf16.vlgmr.msra.gmra.mxu2 %vm66_vm0, %v55_v13  ;;  %vm625_vm7 = vcmp.lt.s32.totalorder %v1441_v36, 127  ;;  %vm730_vm8 = vcmp.lt.s32.totalorder %v1441_v36, 113  ;;  %vm835_vm9 = vcmp.lt.s32.totalorder %v1441_v36, 112  ;;  %vm940_vm10 = vcmp.lt.s32.totalorder %v1441_v36, 111 }
   0xf   :  { %1191 = vmatmul.msk.bf16.vlgmr.msra.gmra.mxu3 %vm66_vm0, %v55_v13 }
  0x7d   :  { %v64_v15 = vpop.permute.xlu0 %63 }
  0x8a   :  { %v79_v16 = vpop.f32.mrf.mxu0  ;;  %v92_v18 = vpop.f32.mrf.mxu1 }
  0x8b   :  { %v80_v17 = vadd.f32 %v79_v16, %v64_v15  ;;  %v93_v19 = vadd.f32 %v92_v18, %v64_v15  ;;  %v347_v18 = vperm.slane %v1202_v11, 1 }
  0x8d   :  { %v1398_v20 = vmax.f32 %v80_v17, 0.0  ;;  %v1400_v21 = vmax.f32 %v93_v19, 0.0  ;;  %v346_v17 = vperm.slane %v1202_v11, 0 }
  0x8f   :  { %160 = vrot.lane.b32.xlu2 %v1398_v20, %s1332_s2  ;;  %162 = vrot.lane.b32.xlu0 %v1400_v21, %s1332_s2 }
  0x91   :  { %v105_v22 = vpop.f32.mrf.mxu2 }
  0x92   :  { %v106_v23 = vadd.f32 %v105_v22, %v64_v15  ;;  %v118_v24 = vpop.f32.mrf.mxu3  ;;  %v81_v25 = vpop.f32.mrf.mxu0 }
  0x93   :  { %v94_v26 = vpop.f32.mrf.mxu1  ;;  %v119_v28 = vadd.f32 %v118_v24, %v64_v15  ;;  %v146_v15 = vperm.slane %v1446_v37, 3  ;;  %v348_v37 = vperm.slane %v1202_v11, 2 }
  0x94   :  { %v1404_v27 = vmax.f32 %v106_v23, 0.0  ;;  %v155_v23 = vld [vmem:[%s1686_s3] sm:$0x3] }
  0x95   :  { %v1409_v31 = vmax.f32 %v119_v28, 0.0 }
  0x96   :  { %164 = vrot.lane.b32.xlu1 %v1404_v27, %s1332_s2 }
  0x97   :  { %128 = vrot.lane.b32.xlu2 %v1400_v21, %s1333_s5  ;;  %130 = vrot.lane.b32.xlu0 %v1404_v27, %s1333_s5 }
  0x99   :  { %v107_v29 = vpop.f32.mrf.mxu2 }
  0x9a   :  { %v120_v30 = vpop.f32.mrf.mxu3 }
  0x9e   :  { %166 = vrot.lane.b32.xlu1 %v1409_v31, %s1332_s2 }
  0x9f   :  { %126 = vrot.lane.b32.xlu2 %v1398_v20, %s1333_s5  ;;  %332 = vrot.lane.b32.xlu0 %v1400_v21, %s1334_s15 }
  0xa6   :  { %132 = vrot.lane.b32.xlu1 %v1409_v31, %s1333_s5 }
  0xa7   :  { %336 = vrot.lane.b32.xlu2 %v1409_v31, %s1334_s15  ;;  %330 = vrot.lane.b32.xlu0 %v1398_v20, %s1334_s15 }
  0xae   :  { %334 = vrot.lane.b32.xlu1 %v1404_v27, %s1334_s15  ;;  %s1175_s15 = sshll.u32 %s1691_s8, 4  ;;  %s1176_s15 = int_to_ptr.hbm [resolvable:$true] %s1175_s15 }
  0xaf   :  { %439 = vrot.lane.b32.xlu2 %v1404_v27, %s1335_s16  ;;  %441 = vrot.lane.b32.xlu0 %v1409_v31, %s1335_s16 }
  0xb6   :  { %437 = vrot.lane.b32.xlu1 %v1400_v21, %s1335_s16 }
  0xb7   :  { %617 = vrot.lane.b32.xlu2 %v1398_v20, %s1336_s17  ;;  %621 = vrot.lane.b32.xlu0 %v1404_v27, %s1336_s17 }
  0xbe   :  { %435 = vrot.lane.b32.xlu1 %v1398_v20, %s1335_s16 }
  0xbf   :  { %619 = vrot.lane.b32.xlu2 %v1400_v21, %s1336_s17  ;;  %722 = vrot.lane.b32.xlu0 %v1398_v20, %s1337_s18 }
  0xc6   :  { %623 = vrot.lane.b32.xlu1 %v1409_v31, %s1336_s17 }
  0xc7   :  { %728 = vrot.lane.b32.xlu2 %v1409_v31, %s1337_s18  ;;  %724 = vrot.lane.b32.xlu0 %v1400_v21, %s1337_s18 }
  0xce   :  { %726 = vrot.lane.b32.xlu1 %v1404_v27, %s1337_s18 }
  0xcf   :  { %831 = vrot.lane.b32.xlu2 %v1404_v27, %s1338_s19  ;;  %833 = vrot.lane.b32.xlu0 %v1409_v31, %s1338_s19 }
  0xd6   :  { %827 = vrot.lane.b32.xlu1 %v1398_v20, %s1338_s19 }
  0xd7   :  { %932 = vrot.lane.b32.xlu2 %v1398_v20, %s1339_s20  ;;  %936 = vrot.lane.b32.xlu0 %v1404_v27, %s1339_s20 }
  0xde   :  { %829 = vrot.lane.b32.xlu1 %v1400_v21, %s1338_s19 }
  0xdf   :  { %934 = vrot.lane.b32.xlu2 %v1400_v21, %s1339_s20  ;;  %1040 = vperm.xlu0 %1265, %v1037_v32  }
  0xe6   :  { %938 = vrot.lane.b32.xlu1 %v1409_v31, %s1339_s20 }
  0xe9   :  { %v161_v33 = vpop.permute.xlu2 %160 }
  0xf1   :  { %v129_v34 = vpop.permute.xlu2 %128 }
  0xf9   :  { %v127_v38 = vpop.permute.xlu2 %126 }
  0xfa   :  { %v139_v41 = vsel %vm136_vm1, %v127_v38, %v129_v34 }
  0xfb   :  { %v152_v43 = vmul.f32 %v144_v39, %v139_v41  ;;  %v1208_v39 = vld [vmem:[%s1684_s1 + $0xc] sm:$0xf] }
  0xfd   :  { %v157_v47 = vpack.c.bf16 %v152_v43, %v152_v43 }
  0xff   :  { %v270_v54 = vsel %vm198_vm3, %v157_v47, 0  ;;  %v454_v47 = vperm.slane %v1208_v39, 3 }
 0x101   :  { %v163_v44 = vpop.permute.xlu0 %162  ;;  %v337_v5 = vpop.permute.xlu2 %336 }
 0x102   :  { %v171_v45 = vsel %vm168_vm2, %v161_v33, %v163_v44 }
 0x103   :  { %v185_v46 = vmul.f32 %v177_v42, %v171_v45 }
 0x105   :  { %v191_v49 = vpack.c.bf16 %v185_v46, %v185_v46 }
 0x107   :  { %v203_v51 = vsel %vm198_vm3, %v191_v49, 0 }
 0x108   :  { %v165_v50 = vpop.permute.xlu1 %164  ;;  %231 = vmatpush.bf16.msrb.mxu1 %v203_v51 }
 0x109   :  { %v170_v53 = vsel %vm168_vm2, %v163_v44, %v165_v50  ;;  %v131_v57 = vpop.permute.xlu0 %130  ;;  %v440_v30 = vpop.permute.xlu2 %439 }
 0x10a   :  { %v186_v56 = vmul.f32 %v178_v48, %v170_v53  ;;  %v138_v58 = vsel %vm136_vm1, %v129_v34, %v131_v57 }
 0x10b   :  { %v153_v59 = vmul.f32 %v145_v52, %v138_v58  ;;  %1195 = vmatmul.msk.bf16.vlgmr.msrb.gmra.mxu1 %vm194_vm4, %v1193_v55 }
 0x10c   :  { %298 = vmatpush.bf16.msra.mxu1 %v270_v54  ;;  %v192_v60 = vpack.c.bf16 %v186_v56, %v186_v56 }
 0x10d   :  { %v158_v61 = vpack.c.bf16 %v153_v59, %v153_v59 }
 0x10e   :  { %v206_v62 = vsel %vm198_vm3, %v192_v60, 0 }
 0x10f   :  { %244 = vmatpush.bf16.msrb.mxu2 %v206_v62  ;;  %v273_v2 = vsel %vm198_vm3, %v158_v61, 0  ;;  %v453_v61 = vperm.slane %v1208_v39, 2 }
 0x110   :  { %v167_v1 = vpop.permute.xlu1 %166 }
 0x111   :  { %v169_v3 = vsel %vm168_vm2, %v165_v50, %v167_v1  ;;  %v172_v4 = vsel %vm168_vm2, %v167_v1, %v161_v33  ;;  %v333_v8 = vpop.permute.xlu0 %332  ;;  %v1203_v1 = vld [vmem:[%s1686_s3 + $0x4] sm:$0x3] }
 0x112   :  { %v184_v6 = vmul.f32 %v176_v63, %v172_v4  ;;  %v187_v7 = vmul.f32 %v179_v0, %v169_v3  ;;  %1196 = vmatmul.msk.bf16.vlgmr.msrb.gmra.mxu2 %vm194_vm4, %v1193_v55 }
 0x113   :  { %311 = vmatpush.bf16.msra.mxu2 %v273_v2 }
 0x114   :  { %v190_v9 = vpack.c.bf16 %v184_v6, %v184_v6  ;;  %v193_v10 = vpack.c.bf16 %v187_v7, %v187_v7  ;;  %v451_v6 = vperm.slane %v1208_v39, 0  ;;  %v452_v7 = vperm.slane %v1208_v39, 1 }
 0x116   :  { %v200_v12 = vsel %vm198_vm3, %v190_v9, 0  ;;  %v209_v13 = vsel %vm198_vm3, %v193_v10, 0  ;;  %v1219_v9 = vld [vmem:[%s1684_s1 + $0x14] sm:$0xf] }
 0x117   :  { %218 = vmatpush.bf16.msrb.mxu0 %v200_v12  ;;  %257 = vmatpush.bf16.msrb.mxu3 %v209_v13  ;;  %v633_v39 = vperm.slane %v1219_v9, 0 }
 0x118   :  { %v133_v16 = vpop.permute.xlu1 %132 }
 0x119   :  { %v137_v19 = vsel %vm136_vm1, %v131_v57, %v133_v16  ;;  %v140_v22 = vsel %vm136_vm1, %v133_v16, %v127_v38  ;;  %v331_v26 = vpop.permute.xlu0 %330  ;;  %v349_v38 = vperm.slane %v1202_v11, 3  ;;  %v1513_v57 = vpop.permute.xlu2 %617  ;;  %v634_v11 = vperm.slane %v1219_v9, 1 }
 0x11a   :  { %v151_v24 = vmul.f32 %v143_v14, %v140_v22  ;;  %v154_v25 = vmul.f32 %v146_v15, %v137_v19  ;;  %1197 = vmatmul.msk.bf16.vlgmr.msrb.gmra.mxu3 %vm194_vm4, %v1193_v55  ;;  %1194 = vmatmul.msk.bf16.vlgmr.msrb.gmra.mxu0 %vm194_vm4, %v1193_v55  ;;  %v341_v28 = vsel %vm338_vm5, %v331_v26, %v333_v8 }
 0x11b   :  { %v342_v29 = vsel %vm338_vm5, %v337_v5, %v331_v26  ;;  %v355_v35 = vmul.f32 %v347_v18, %v341_v28  ;;  %1199 = vmatmul.msk.bf16.vlgmr.msra.gmra.mxu1 %vm194_vm4, %v155_v23  ;;  %v543_v18 = vpack.c.bf16 %v1400_v21, %v1400_v21 }
 0x11c   :  { %v156_v32 = vpack.c.bf16 %v151_v24, %v151_v24  ;;  %v159_v33 = vpack.c.bf16 %v154_v25, %v154_v25  ;;  %v354_v34 = vmul.f32 %v346_v17, %v342_v29  ;;  %v542_v24 = vpack.c.bf16 %v1398_v20, %v1398_v20 }
 0x11d   :  { %v361_v41 = vpack.c.bf16 %v355_v35, %v355_v35  ;;  %v635_v29 = vperm.slane %v1219_v9, 2  ;;  %v553_v21 = vsel %vm198_vm3, %v543_v18, 0 }
 0x11e   :  { %v360_v40 = vpack.c.bf16 %v354_v34, %v354_v34  ;;  %v267_v42 = vsel %vm198_vm3, %v156_v32, 0  ;;  %v276_v43 = vsel %vm198_vm3, %v159_v33, 0  ;;  %v1209_v34 = vld [vmem:[%s1686_s3 + $0x6] sm:$0x3] }
 0x11f   :  { %285 = vmatpush.bf16.msra.mxu0 %v267_v42  ;;  %324 = vmatpush.bf16.msra.mxu3 %v276_v43  ;;  %v371_v46 = vsel %vm198_vm3, %v361_v41, 0  ;;  %v1225_v43 = vld [vmem:[%s1684_s1 + $0x18] sm:$0xf] }
 0x120   :  { %v335_v44 = vpop.permute.xlu1 %334  ;;  %v368_v45 = vsel %vm198_vm3, %v360_v40, 0  ;;  %399 = vmatpush.bf16.msrb.mxu1 %v371_v46  ;;  %v636_v40 = vperm.slane %v1219_v9, 3  ;;  %v739_v46 = vperm.slane %v1225_v43, 1 }
 0x121   :  { %v339_v48 = vsel %vm338_vm5, %v335_v44, %v337_v5  ;;  %v340_v49 = vsel %vm338_vm5, %v333_v8, %v335_v44  ;;  %v442_v52 = vpop.permute.xlu0 %441  ;;  %v544_v8 = vpack.c.bf16 %v1404_v27, %v1404_v27  ;;  %v620_v10 = vpop.permute.xlu2 %619 }
 0x122   :  { %v356_v50 = vmul.f32 %v348_v37, %v340_v49  ;;  %v357_v51 = vmul.f32 %v349_v38, %v339_v48  ;;  %1200 = vmatmul.msk.bf16.vlgmr.msra.gmra.mxu2 %vm194_vm4, %v155_v23  ;;  %v444_v53 = vsel %vm443_vm6, %v440_v30, %v442_v52  ;;  %v550_v37 = vsel %vm198_vm3, %v542_v24, 0 }
 0x123   :  { %386 = vmatpush.bf16.msrb.mxu0 %v368_v45  ;;  %v462_v56 = vmul.f32 %v454_v47, %v444_v53  ;;  %v556_v17 = vsel %vm198_vm3, %v544_v8, 0  ;;  %v628_v42 = vsel %vm625_vm7, %v1513_v57, %v620_v10 }
 0x124   :  { %v362_v54 = vpack.c.bf16 %v356_v50, %v356_v50  ;;  %v363_v55 = vpack.c.bf16 %v357_v51, %v357_v51  ;;  %v641_v49 = vmul.f32 %v633_v39, %v628_v42 }
 0x125   :  { %v468_v58 = vpack.c.bf16 %v462_v56, %v462_v56  ;;  %v740_v56 = vperm.slane %v1225_v43, 2 }
 0x126   :  { %v374_v59 = vsel %vm198_vm3, %v362_v54, 0  ;;  %v377_v60 = vsel %vm198_vm3, %v363_v55, 0  ;;  %v647_v54 = vpack.c.bf16 %v641_v49, %v641_v49 }
 0x127   :  { %412 = vmatpush.bf16.msrb.mxu2 %v374_v59  ;;  %425 = vmatpush.bf16.msrb.mxu3 %v377_v60  ;;  %v482_v63 = vsel %vm198_vm3, %v468_v58, 0  ;;  %v1214_v60 = vld [vmem:[%s1686_s3 + $0x8] sm:$0x3] }
 0x128   :  { %v438_v62 = vpop.permute.xlu1 %437 }
 0x129   :  { %v445_v0 = vsel %vm443_vm6, %v438_v62, %v440_v30  ;;  %v622_v4 = vpop.permute.xlu0 %621  ;;  %v545_v30 = vpack.c.bf16 %v1409_v31, %v1409_v31  ;;  %v729_v50 = vpop.permute.xlu2 %728 }
 0x12a   :  { %v461_v2 = vmul.f32 %v453_v61, %v445_v0  ;;  %1201 = vmatmul.msk.bf16.vlgmr.msra.gmra.mxu3 %vm194_vm4, %v155_v23  ;;  %1198 = vmatmul.msk.bf16.vlgmr.msra.gmra.mxu0 %vm194_vm4, %v155_v23  ;;  %v627_v13 = vsel %vm625_vm7, %v620_v10, %v622_v4 }
 0x12b   :  { %530 = vmatpush.bf16.msra.mxu3 %v482_v63  ;;  %1205 = vmatmul.msk.bf16.vlgmr.msrb.gmra.mxu1 %vm194_vm4, %v1203_v1  ;;  %v642_v19 = vmul.f32 %v634_v11, %v627_v13  ;;  %v559_v31 = vsel %vm198_vm3, %v545_v30, 0 }
 0x12c   :  { %v467_v3 = vpack.c.bf16 %v461_v2, %v461_v2  ;;  %v741_v2 = vperm.slane %v1225_v43, 3 }
 0x12d   :  { %v648_v32 = vpack.c.bf16 %v642_v19, %v642_v19 }
 0x12e   :  { %v479_v5 = vsel %vm198_vm3, %v467_v3, 0  ;;  %v738_v3 = vperm.slane %v1225_v43, 0 }
 0x12f   :  { %517 = vmatpush.bf16.msra.mxu2 %v479_v5  ;;  %v658_v38 = vsel %vm198_vm3, %v648_v32, 0 }
 0x130   :  { %v436_v12 = vpop.permute.xlu1 %435 }
 0x131   :  { %v446_v14 = vsel %vm443_vm6, %v436_v12, %v438_v62  ;;  %v447_v15 = vsel %vm443_vm6, %v442_v52, %v436_v12  ;;  %v1545_v25 = vpop.permute.xlu0 %722  ;;  %v655_v62 = vsel %vm198_vm3, %v647_v54, 0  ;;  %v832_v0 = vpop.permute.xlu2 %831 }
 0x132   :  { %v459_v27 = vmul.f32 %v451_v6, %v447_v15  ;;  %v460_v16 = vmul.f32 %v452_v7, %v446_v14  ;;  %1206 = vmatmul.msk.bf16.vlgmr.msrb.gmra.mxu2 %vm194_vm4, %v1203_v1  ;;  %v734_v5 = vsel %vm730_vm8, %v729_v50, %v1545_v25  ;;  %v1231_v7 = vld [vmem:[%s1684_s1 + $0x1c] sm:$0xf] }
 0x133   :  { %594 = vmatpush.bf16.msrb.mxu2 %v556_v17  ;;  %v844_v8 = vperm.slane %v1231_v7, 1  ;;  %v749_v11 = vmul.f32 %v741_v2, %v734_v5  ;;  %v845_v18 = vperm.slane %v1231_v7, 2  ;;  %v846_v30 = vperm.slane %v1231_v7, 3  ;;  %v1238_v2 = vld [vmem:[%s1686_s3 + $0x10] sm:$0x3] }
 0x134   :  { %v465_v22 = vpack.c.bf16 %v459_v27, %v459_v27  ;;  %v466_v23 = vpack.c.bf16 %v460_v16, %v460_v16  ;;  %v843_v32 = vperm.slane %v1231_v7, 0 }
 0x135   :  { %v755_v27 = vpack.c.bf16 %v749_v11, %v749_v11 }
 0x136   :  { %v473_v26 = vsel %vm198_vm3, %v465_v22, 0  ;;  %v476_v28 = vsel %vm198_vm3, %v466_v23, 0  ;;  %v1220_v23 = vld [vmem:[%s1686_s3 + $0xa] sm:$0x3] }
 0x137   :  { %491 = vmatpush.bf16.msra.mxu0 %v473_v26  ;;  %504 = vmatpush.bf16.msra.mxu1 %v476_v28  ;;  %v769_v26 = vsel %vm198_vm3, %v755_v27, 0 }
 0x138   :  { %v624_v33 = vpop.permute.xlu1 %623 }
 0x139   :  { %v626_v20 = vsel %vm625_vm7, %v622_v4, %v624_v33  ;;  %v629_v44 = vsel %vm625_vm7, %v624_v33, %v1513_v57  ;;  %v725_v45 = vpop.permute.xlu0 %724  ;;  %v933_v16 = vpop.permute.xlu2 %932  ;;  %v1237_v33 = vld [vmem:[%s1684_s1 + $0x20] sm:$0xf] }
 0x13a   :  { %v643_v35 = vmul.f32 %v635_v29, %v626_v20  ;;  %1204 = vmatmul.msk.bf16.vlgmr.msrb.gmra.mxu0 %vm194_vm4, %v1203_v1  ;;  %1207 = vmatmul.msk.bf16.vlgmr.msrb.gmra.mxu3 %vm194_vm4, %v1203_v1  ;;  %v644_v51 = vmul.f32 %v636_v40, %v629_v44  ;;  %v733_v6 = vsel %vm730_vm8, %v1545_v25, %v725_v45  ;;  %v951_v54 = vperm.slane %v1237_v33, 3 }
 0x13b   :  { %581 = vmatpush.bf16.msrb.mxu1 %v553_v21  ;;  %607 = vmatpush.bf16.msrb.mxu3 %v559_v31  ;;  %v746_v12 = vmul.f32 %v738_v3, %v733_v6  ;;  %v949_v31 = vperm.slane %v1237_v33, 1 }
 0x13c   :  { %568 = vmatpush.bf16.msrb.mxu0 %v550_v37  ;;  %1211 = vmatmul.msk.bf16.vlgmr.msra.gmra.mxu1 %vm194_vm4, %v1209_v34  ;;  %v649_v41 = vpack.c.bf16 %v643_v35, %v643_v35  ;;  %v650_v55 = vpack.c.bf16 %v644_v51, %v644_v51 }
 0x13d   :  { %v752_v17 = vpack.c.bf16 %v746_v12, %v746_v12 }
 0x13e   :  { %v661_v52 = vsel %vm198_vm3, %v649_v41, 0  ;;  %v664_v63 = vsel %vm198_vm3, %v650_v55, 0 }
 0x13f   :  { %686 = vmatpush.bf16.msra.mxu1 %v658_v38  ;;  %v760_v25 = vsel %vm198_vm3, %v752_v17, 0 }
 0x140   :  { %v727_v47 = vpop.permute.xlu1 %726 }
 0x141   :  { %v732_v48 = vsel %vm730_vm8, %v725_v45, %v727_v47  ;;  %v731_v57 = vsel %vm730_vm8, %v727_v47, %v729_v50  ;;  %v834_v14 = vpop.permute.xlu0 %833  ;;  %v935_v35 = vpop.permute.xlu2 %934  ;;  %v950_v45 = vperm.slane %v1237_v33, 2 }
 0x142   :  { %1212 = vmatmul.msk.bf16.vlgmr.msra.gmra.mxu2 %vm194_vm4, %v1209_v34  ;;  %v747_v53 = vmul.f32 %v739_v46, %v732_v48  ;;  %v748_v61 = vmul.f32 %v740_v56, %v731_v57  ;;  %v836_v19 = vsel %vm835_vm9, %v832_v0, %v834_v14  ;;  %v1226_v48 = vld [vmem:[%s1686_s3 + $0xc] sm:$0x3]  ;;  %v943_v56 = vsel %vm940_vm10, %v933_v16, %v935_v35 }
 0x143   :  { %699 = vmatpush.bf16.msra.mxu2 %v661_v52  ;;  %v853_v24 = vmul.f32 %v845_v18, %v836_v19 }
 0x144   :  { %v753_v58 = vpack.c.bf16 %v747_v53, %v747_v53  ;;  %v754_v4 = vpack.c.bf16 %v748_v61, %v748_v61  ;;  %v948_v53 = vperm.slane %v1237_v33, 0 }
 0x145   :  { %v859_v29 = vpack.c.bf16 %v853_v24, %v853_v24 }
 0x146   :  { %v763_v1 = vsel %vm198_vm3, %v753_v58, 0  ;;  %v766_v13 = vsel %vm198_vm3, %v754_v4, 0  ;;  %v956_v58 = vmul.f32 %v948_v53, %v943_v56 }
 0x147   :  { %v871_v40 = vsel %vm198_vm3, %v859_v29, 0 }
 0x148   :  { %v828_v59 = vpop.permute.xlu1 %827  ;;  %v962_v61 = vpack.c.bf16 %v956_v58, %v956_v58 }
 0x149   :  { %v937_v21 = vpop.permute.xlu0 %936  ;;  %v839_v20 = vsel %vm835_vm9, %v834_v14, %v828_v59 }
 0x14a   :  { %1210 = vmatmul.msk.bf16.vlgmr.msra.gmra.mxu0 %vm194_vm4, %v1209_v34  ;;  %1213 = vmatmul.msk.bf16.vlgmr.msra.gmra.mxu3 %vm194_vm4, %v1209_v34  ;;  %v942_v37 = vsel %vm940_vm10, %v935_v35, %v937_v21  ;;  %v854_v38 = vmul.f32 %v846_v30, %v839_v20  ;;  %v970_v36 = vsel %vm198_vm3, %v962_v61, 0 }
 0x14b   :  { %673 = vmatpush.bf16.msra.mxu0 %v655_v62  ;;  %712 = vmatpush.bf16.msra.mxu3 %v664_v63  ;;  %v957_v41 = vmul.f32 %v949_v31, %v942_v37  ;;  %v1232_v63 = vld [vmem:[%s1686_s3 + $0xe] sm:$0x3] }
 0x14c   :  { %1216 = vmatmul.msk.bf16.vlgmr.msrb.gmra.mxu1 %vm194_vm4, %v1214_v60  ;;  %v860_v43 = vpack.c.bf16 %v854_v38, %v854_v38 }
 0x14d   :  { %791 = vmatpush.bf16.msrb.mxu1 %v763_v1  ;;  %v963_v47 = vpack.c.bf16 %v957_v41, %v957_v41 }
 0x14e   :  { %v874_v51 = vsel %vm198_vm3, %v860_v43, 0 }
 0x14f   :  { %v973_v52 = vsel %vm198_vm3, %v963_v47, 0 }
 0x150   :  { %v830_v9 = vpop.permute.xlu1 %829 }
 0x151   :  { %v837_v10 = vsel %vm835_vm9, %v830_v9, %v832_v0  ;;  %v838_v34 = vsel %vm835_vm9, %v828_v59, %v830_v9 }
 0x152   :  { %1217 = vmatmul.msk.bf16.vlgmr.msrb.gmra.mxu2 %vm194_vm4, %v1214_v60  ;;  %v852_v15 = vmul.f32 %v844_v8, %v837_v10  ;;  %v851_v39 = vmul.f32 %v843_v32, %v838_v34 }
 0x153   :  { %804 = vmatpush.bf16.msrb.mxu2 %v766_v13 }
 0x154   :  { %v858_v22 = vpack.c.bf16 %v852_v15, %v852_v15  ;;  %v857_v44 = vpack.c.bf16 %v851_v39, %v851_v39 }
 0x156   :  { %v868_v28 = vsel %vm198_vm3, %v858_v22, 0  ;;  %v865_v50 = vsel %vm198_vm3, %v857_v44, 0 }
 0x158   :  { %v939_v42 = vpop.permute.xlu1 %938 }
 0x159   :  { %v941_v46 = vsel %vm940_vm10, %v937_v21, %v939_v42  ;;  %v944_v57 = vsel %vm940_vm10, %v939_v42, %v933_v16 }
 0x15a   :  { %1215 = vmatmul.msk.bf16.vlgmr.msrb.gmra.mxu0 %vm194_vm4, %v1214_v60  ;;  %1218 = vmatmul.msk.bf16.vlgmr.msrb.gmra.mxu3 %vm194_vm4, %v1214_v60  ;;  %v958_v49 = vmul.f32 %v950_v45, %v941_v46  ;;  %v959_v59 = vmul.f32 %v951_v54, %v944_v57 }
 0x15b   :  { %778 = vmatpush.bf16.msrb.mxu0 %v760_v25  ;;  %817 = vmatpush.bf16.msrb.mxu3 %v769_v26 }
 0x15c   :  { %1222 = vmatmul.msk.bf16.vlgmr.msra.gmra.mxu1 %vm194_vm4, %v1220_v23  ;;  %v964_v55 = vpack.c.bf16 %v958_v49, %v958_v49  ;;  %v965_v62 = vpack.c.bf16 %v959_v59, %v959_v59 }
 0x15d   :  { %896 = vmatpush.bf16.msra.mxu1 %v868_v28 }
 0x15e   :  { %v976_v60 = vsel %vm198_vm3, %v964_v55, 0  ;;  %v979_v0 = vsel %vm198_vm3, %v965_v62, 0 }
 0x162   :  { %1223 = vmatmul.msk.bf16.vlgmr.msra.gmra.mxu2 %vm194_vm4, %v1220_v23 }
 0x163   :  { %909 = vmatpush.bf16.msra.mxu2 %v871_v40 }
 0x16a   :  { %1221 = vmatmul.msk.bf16.vlgmr.msra.gmra.mxu0 %vm194_vm4, %v1220_v23  ;;  %1224 = vmatmul.msk.bf16.vlgmr.msra.gmra.mxu3 %vm194_vm4, %v1220_v23 }
 0x16b   :  { %883 = vmatpush.bf16.msra.mxu0 %v865_v50  ;;  %922 = vmatpush.bf16.msra.mxu3 %v874_v51 }
 0x16c   :  { %1228 = vmatmul.msk.bf16.vlgmr.msrb.gmra.mxu1 %vm194_vm4, %v1226_v48 }
 0x16d   :  { %1001 = vmatpush.bf16.msrb.mxu1 %v973_v52 }
 0x172   :  { %1229 = vmatmul.msk.bf16.vlgmr.msrb.gmra.mxu2 %vm194_vm4, %v1226_v48 }
 0x173   :  { %1014 = vmatpush.bf16.msrb.mxu2 %v976_v60 }
 0x17a   :  { %1227 = vmatmul.msk.bf16.vlgmr.msrb.gmra.mxu0 %vm194_vm4, %v1226_v48  ;;  %1230 = vmatmul.msk.bf16.vlgmr.msrb.gmra.mxu3 %vm194_vm4, %v1226_v48 }
 0x17b   :  { %988 = vmatpush.bf16.msrb.mxu0 %v970_v36  ;;  %1027 = vmatpush.bf16.msrb.mxu3 %v979_v0 }
 0x17c   :  { %1234 = vmatmul.msk.bf16.vlgmr.msra.gmra.mxu1 %vm194_vm4, %v1232_v63 }
 0x182   :  { %1235 = vmatmul.msk.bf16.vlgmr.msra.gmra.mxu2 %vm194_vm4, %v1232_v63 }
 0x188   :  { %v233_v1 = vpop.f32.mrf.mxu1 }
 0x18a   :  { %1233 = vmatmul.msk.bf16.vlgmr.msra.gmra.mxu0 %vm194_vm4, %v1232_v63  ;;  %1236 = vmatmul.msk.bf16.vlgmr.msra.gmra.mxu3 %vm194_vm4, %v1232_v63 }
 0x18c   :  { %1240 = vmatmul.msk.bf16.vlgmr.msrb.gmra.mxu1 %vm194_vm4, %v1238_v2 }
 0x190   :  { %v235_v3 = vpop.f32.mrf.mxu1 }
 0x192   :  { %1241 = vmatmul.msk.bf16.vlgmr.msrb.gmra.mxu2 %vm194_vm4, %v1238_v2 }
 0x195   :  { %v246_v4 = vpop.f32.mrf.mxu2 }
 0x197   :  { %v220_v5 = vpop.f32.mrf.mxu0 }
 0x198   :  { %v300_v6 = vpop.f32.mrf.mxu1 }
 0x199   :  { %v301_v7 = vadd.f32 %v300_v6, %v233_v1 }
 0x19a   :  { %1239 = vmatmul.msk.bf16.vlgmr.msrb.gmra.mxu0 %vm194_vm4, %v1238_v2  ;;  %1242 = vmatmul.msk.bf16.vlgmr.msrb.gmra.mxu3 %vm194_vm4, %v1238_v2 }
 0x19d   :  { %v248_v8 = vpop.f32.mrf.mxu2  ;;  %v259_v9 = vpop.f32.mrf.mxu3 }
 0x19f   :  { %v222_v10 = vpop.f32.mrf.mxu0 }
 0x1a0   :  { %v302_v11 = vpop.f32.mrf.mxu1 }
 0x1a5   :  { %v261_v12 = vpop.f32.mrf.mxu3  ;;  %v313_v13 = vpop.f32.mrf.mxu2 }
 0x1a6   :  { %v314_v14 = vadd.f32 %v313_v13, %v246_v4 }
 0x1a7   :  { %v287_v15 = vpop.f32.mrf.mxu0 }
 0x1a8   :  { %v288_v27 = vadd.f32 %v287_v15, %v220_v5  ;;  %v401_v16 = vpop.f32.mrf.mxu1 }
 0x1a9   :  { %v432_v17 = vadd.f32 %v401_v16, %v301_v7  ;;  %v1058_v16 = vld [vmem:[%s1690_s7 + $0x8] sm:$0xff] }
 0x1aa   :  { %1066 = vperm.xlu2 %1267, %v1058_v16   ;;  %v1271_v16 = vld [vmem:[#allocation2 + $0x10] sm:$0xff] }
 0x1ad   :  { %v315_v18 = vpop.f32.mrf.mxu2  ;;  %v326_v19 = vpop.f32.mrf.mxu3 }
 0x1ae   :  { %v327_v22 = vadd.f32 %v326_v19, %v259_v9 }
 0x1af   :  { %v289_v23 = vpop.f32.mrf.mxu0 }
 0x1b0   :  { %v403_v24 = vpop.f32.mrf.mxu1 }
 0x1b5   :  { %v328_v25 = vpop.f32.mrf.mxu3  ;;  %v414_v26 = vpop.f32.mrf.mxu2 }
 0x1b6   :  { %v433_v28 = vadd.f32 %v414_v26, %v314_v14 }
 0x1b7   :  { %v388_v29 = vpop.f32.mrf.mxu0 }
 0x1b8   :  { %v431_v30 = vadd.f32 %v388_v29, %v288_v27  ;;  %v1057_v27 = vld [vmem:[%s1690_s7] sm:$0xff] }
 0x1b9   :  { %v506_v21 = vpop.f32.mrf.mxu1  ;;  %1061 = vperm.xlu1 %1266, %v1057_v27  }
 0x1ba   :  { %v537_v32 = vadd.f32 %v506_v21, %v432_v17  ;;  %v1041_v17 = vpop.permute.xlu0 %1040 }
 0x1bd   :  { %v416_v33 = vpop.f32.mrf.mxu2  ;;  %v427_v20 = vpop.f32.mrf.mxu3 }
 0x1be   :  { %v434_v34 = vadd.f32 %v427_v20, %v327_v22 }
 0x1bf   :  { %v390_v35 = vpop.f32.mrf.mxu0 }
 0x1c0   :  { %v1251_v35 = vld [vmem:[%s1687_s4] sm:$0xff]  ;;  %s1340_s4 = smov [#allocation5]  }
 0x1c1   :  { %v508_v31 = vpop.f32.mrf.mxu1  ;;  %s1173_s14 = sshll.u32 %s1340_s4, 4  ;;  %s1174_s14 = int_to_ptr.vmem [resolvable:$true] %s1173_s14 }
 0x1c5   :  { %v429_v37 = vpop.f32.mrf.mxu3  ;;  %v519_v38 = vpop.f32.mrf.mxu2 }
 0x1c6   :  { %v538_v39 = vadd.f32 %v519_v38, %v433_v28 }
 0x1c7   :  { %v493_v40 = vpop.f32.mrf.mxu0 }
 0x1c8   :  { %v536_v41 = vadd.f32 %v493_v40, %v431_v30 }
 0x1c9   :  { %v583_v42 = vpop.f32.mrf.mxu1 }
 0x1ca   :  { %v614_v7 = vadd.f32 %v583_v42, %v537_v32 }
 0x1cd   :  { %v521_v43 = vpop.f32.mrf.mxu2  ;;  %v532_v44 = vpop.f32.mrf.mxu3 }
 0x1ce   :  { %v539_v45 = vadd.f32 %v532_v44, %v434_v34 }
 0x1cf   :  { %v495_v46 = vpop.f32.mrf.mxu0 }
 0x1d1   :  { %v585_v47 = vpop.f32.mrf.mxu1 }
 0x1d5   :  { %v534_v48 = vpop.f32.mrf.mxu3  ;;  %v596_v49 = vpop.f32.mrf.mxu2 }
 0x1d6   :  { %v615_v23 = vadd.f32 %v596_v49, %v538_v39 }
 0x1d7   :  { %v570_v50 = vpop.f32.mrf.mxu0 }
 0x1d8   :  { %v613_v26 = vadd.f32 %v570_v50, %v536_v41 }
 0x1d9   :  { %v688_v51 = vpop.f32.mrf.mxu1 }
 0x1da   :  { %v719_v8 = vadd.f32 %v688_v51, %v614_v7  ;;  %v1269_v7 = vld [vmem:[#allocation2 + $0x28] sm:$0xff] }
 0x1dd   :  { %v598_v52 = vpop.f32.mrf.mxu2  ;;  %v609_v53 = vpop.f32.mrf.mxu3 }
 0x1de   :  { %v616_v38 = vadd.f32 %v609_v53, %v539_v45 }
 0x1df   :  { %v572_v54 = vpop.f32.mrf.mxu0 }
 0x1e1   :  { %v690_v55 = vpop.f32.mrf.mxu1 }
 0x1e5   :  { %v611_v56 = vpop.f32.mrf.mxu3  ;;  %v701_v57 = vpop.f32.mrf.mxu2 }
 0x1e6   :  { %v720_v28 = vadd.f32 %v701_v57, %v615_v23  ;;  %v1272_v23 = vld [vmem:[#allocation2 + $0x20] sm:$0xff] }
 0x1e7   :  { %v675_v58 = vpop.f32.mrf.mxu0 }
 0x1e8   :  { %v718_v21 = vadd.f32 %v675_v58, %v613_v26 }
 0x1e9   :  { %v793_v59 = vpop.f32.mrf.mxu1 }
 0x1ea   :  { %v824_v11 = vadd.f32 %v793_v59, %v719_v8 }
 0x1ed   :  { %v703_v60 = vpop.f32.mrf.mxu2  ;;  %v714_v61 = vpop.f32.mrf.mxu3 }
 0x1ee   :  { %v721_v42 = vadd.f32 %v714_v61, %v616_v38  ;;  %v1275_v38 = vld [vmem:[#allocation2 + $0x38] sm:$0xff] }
 0x1ef   :  { %v677_v62 = vpop.f32.mrf.mxu0 }
 0x1f1   :  { %v795_v63 = vpop.f32.mrf.mxu1 }
 0x1f5   :  { %v716_v36 = vpop.f32.mrf.mxu3  ;;  %v806_v0 = vpop.f32.mrf.mxu2 }
 0x1f6   :  { %v825_v32 = vadd.f32 %v806_v0, %v720_v28 }
 0x1f7   :  { %v780_v1 = vpop.f32.mrf.mxu0 }
 0x1f8   :  { %v823_v20 = vadd.f32 %v780_v1, %v718_v21  ;;  %v1268_v1 = vld [vmem:[#allocation2 + $0x8] sm:$0xff]  ;;  %v1273_v21 = vld [vmem:[#allocation2 + $0x18] sm:$0xff] }
 0x1f9   :  { %v898_v2 = vpop.f32.mrf.mxu1 }
 0x1fa   :  { %v929_v13 = vadd.f32 %v898_v2, %v824_v11 }
 0x1fd   :  { %v808_v3 = vpop.f32.mrf.mxu2  ;;  %v819_v4 = vpop.f32.mrf.mxu3 }
 0x1fe   :  { %v826_v46 = vadd.f32 %v819_v4, %v721_v42 }
 0x1ff   :  { %v782_v5 = vpop.f32.mrf.mxu0 }
 0x201   :  { %v900_v6 = vpop.f32.mrf.mxu1 }
 0x204   :  { %v1067_v4 = vpop.permute.xlu2 %1066 }
 0x205   :  { %v821_v9 = vpop.f32.mrf.mxu3  ;;  %v911_v10 = vpop.f32.mrf.mxu2 }
 0x206   :  { %v930_v34 = vadd.f32 %v911_v10, %v825_v32 }
 0x207   :  { %v885_v12 = vpop.f32.mrf.mxu0 }
 0x208   :  { %v928_v39 = vadd.f32 %v885_v12, %v823_v20  ;;  %v1270_v12 = vld [vmem:[#allocation2] sm:$0xff] }
 0x209   :  { %v1003_v14 = vpop.f32.mrf.mxu1 }
 0x20a   :  { %v1034_v15 = vadd.f32 %v1003_v14, %v929_v13 }
 0x20c   :  { %v1044_v18 = vadd.f32 %v1041_v17, %v1034_v15 }
 0x20d   :  { %v913_v19 = vpop.f32.mrf.mxu2  ;;  %v924_v22 = vpop.f32.mrf.mxu3 }
 0x20e   :  { %v1048_v24 = vmax.f32 %v1044_v18, 0.0  ;;  %v931_v49 = vadd.f32 %v924_v22, %v826_v46 }
 0x20f   :  { %v887_v25 = vpop.f32.mrf.mxu0 }
 0x210   :  { %v1054_v29 = vpack.c.bf16 %v1048_v24, %v1048_v24 }
 0x211   :  { %v1005_v30 = vpop.f32.mrf.mxu1 }
 0x212   :  { %v1081_v33 = vsel %vm198_vm3, %v1054_v29, 0 }
 0x213   :  { %1110 = vmatpush.bf16.msra.mxu1 %v1081_v33  ;;  %v1274_v33 = vld [vmem:[#allocation2 + $0x30] sm:$0xff] }
 0x215   :  { %v926_v31 = vpop.f32.mrf.mxu3  ;;  %v1016_v37 = vpop.f32.mrf.mxu2 }
 0x216   :  { %v1035_v40 = vadd.f32 %v1016_v37, %v930_v34  ;;  %1248 = vmatmul.msk.bf16.vlgmr.msra.gmra.mxu1 %vm194_vm4, %v1251_v35 }
 0x217   :  { %v990_v41 = vpop.f32.mrf.mxu0 }
 0x218   :  { %v1045_v43 = vadd.f32 %v1041_v17, %v1035_v40  ;;  %v1033_v44 = vadd.f32 %v990_v41, %v928_v39 }
 0x21a   :  { %v1049_v47 = vmax.f32 %v1045_v43, 0.0  ;;  %v1043_v48 = vadd.f32 %v1041_v17, %v1033_v44 }
 0x21c   :  { %v1055_v50 = vpack.c.bf16 %v1049_v47, %v1049_v47  ;;  %v1047_v51 = vmax.f32 %v1043_v48, 0.0 }
 0x21d   :  { %v1018_v52 = vpop.f32.mrf.mxu2  ;;  %v1029_v54 = vpop.f32.mrf.mxu3 }
 0x21e   :  { %v1053_v55 = vpack.c.bf16 %v1047_v51, %v1047_v51  ;;  %v1036_v56 = vadd.f32 %v1029_v54, %v931_v49  ;;  %v1084_v45 = vsel %vm198_vm3, %v1055_v50, 0 }
 0x21f   :  { %1124 = vmatpush.bf16.msra.mxu2 %v1084_v45  ;;  %v992_v53 = vpop.f32.mrf.mxu0 }
 0x220   :  { %v1046_v57 = vadd.f32 %v1041_v17, %v1036_v56  ;;  %v1078_v58 = vsel %vm198_vm3, %v1053_v55, 0 }
 0x221   :  { %1096 = vmatpush.bf16.msra.mxu0 %v1078_v58 }
 0x222   :  { %v1050_v59 = vmax.f32 %v1046_v57, 0.0  ;;  %1249 = vmatmul.msk.bf16.vlgmr.msra.gmra.mxu2 %vm194_vm4, %v1251_v35 }
 0x224   :  { %v1056_v60 = vpack.c.bf16 %v1050_v59, %v1050_v59  ;;  %1247 = vmatmul.msk.bf16.vlgmr.msra.gmra.mxu0 %vm194_vm4, %v1251_v35 }
 0x225   :  { %v1031_v61 = vpop.f32.mrf.mxu3 }
 0x226   :  { %v1087_v62 = vsel %vm198_vm3, %v1056_v60, 0 }
 0x227   :  { %1138 = vmatpush.bf16.msra.mxu3 %v1087_v62 }
 0x22a   :  { %1250 = vmatmul.msk.bf16.vlgmr.msra.gmra.mxu3 %vm194_vm4, %v1251_v35 }
 0x22b   :  { %v1062_v63 = vpop.permute.xlu1 %1061 }
 0x293   :  { %v1112_v36 = vpop.f32.mrf.mxu1 }
 0x294   :  { %v1113_v0 = vadd.f32 %v1112_v36, %v1062_v63 }
 0x296   :  { %v1146_v2 = vadd.f32 %v1268_v1, %v1113_v0 }
 0x298   :  { %v1154_v3 = vmax.f32 %v1146_v2, 0.0 }
 0x29a   :  { %1162 = vst [vmem:[#allocation5 + $0x8] sm:$0xff] %v1154_v3 }
 0x29b   :  { %v1114_v5 = vpop.f32.mrf.mxu1 }
 0x29c   :  { %v1115_v6 = vadd.f32 %v1114_v5, %v1067_v4 }
 0x29e   :  { %v1150_v8 = vadd.f32 %v1269_v7, %v1115_v6 }
 0x2a0   :  { %v1158_v9 = vmax.f32 %v1150_v8, 0.0 }
 0x2a1   :  { %v1098_v10 = vpop.f32.mrf.mxu0 }
 0x2a2   :  { %v1099_v11 = vadd.f32 %v1098_v10, %v1062_v63  ;;  %1166 = vst [vmem:[#allocation5 + $0x28] sm:$0xff] %v1158_v9 }
 0x2a4   :  { %v1145_v13 = vadd.f32 %v1270_v12, %v1099_v11 }
 0x2a5   :  { %v1126_v14 = vpop.f32.mrf.mxu2 }
 0x2a6   :  { %v1127_v15 = vadd.f32 %v1126_v14, %v1062_v63  ;;  %v1153_v27 = vmax.f32 %v1145_v13, 0.0 }
 0x2a8   :  { %v1147_v17 = vadd.f32 %v1271_v16, %v1127_v15  ;;  %1161 = vst [vmem:[#allocation5] sm:$0xff] %v1153_v27 }
 0x2a9   :  { %v1100_v18 = vpop.f32.mrf.mxu0 }
 0x2aa   :  { %v1155_v19 = vmax.f32 %v1147_v17, 0.0  ;;  %v1101_v22 = vadd.f32 %v1100_v18, %v1067_v4 }
 0x2ac   :  { %1163 = vst [vmem:[#allocation5 + $0x10] sm:$0xff] %v1155_v19  ;;  %v1149_v24 = vadd.f32 %v1272_v23, %v1101_v22 }
 0x2ad   :  { %v1140_v25 = vpop.f32.mrf.mxu3  ;;  %v1128_v26 = vpop.f32.mrf.mxu2 }
 0x2ae   :  { %v1141_v28 = vadd.f32 %v1140_v25, %v1062_v63  ;;  %v1129_v29 = vadd.f32 %v1128_v26, %v1067_v4  ;;  %v1157_v30 = vmax.f32 %v1149_v24, 0.0 }
 0x2b0   :  { %v1148_v32 = vadd.f32 %v1273_v21, %v1141_v28  ;;  %v1151_v20 = vadd.f32 %v1274_v33, %v1129_v29  ;;  %1165 = vst [vmem:[#allocation5 + $0x20] sm:$0xff] %v1157_v30 }
 0x2b2   :  { %v1156_v34 = vmax.f32 %v1148_v32, 0.0  ;;  %v1159_v35 = vmax.f32 %v1151_v20, 0.0 }
 0x2b4   :  { %1164 = vst [vmem:[#allocation5 + $0x18] sm:$0xff] %v1156_v34 }
 0x2b5   :  { %v1142_v31 = vpop.f32.mrf.mxu3  ;;  %1167 = vst [vmem:[#allocation5 + $0x30] sm:$0xff] %v1159_v35 }
 0x2b6   :  { %v1143_v37 = vadd.f32 %v1142_v31, %v1067_v4 }
 0x2b8   :  { %v1152_v39 = vadd.f32 %v1275_v38, %v1143_v37 }
 0x2ba   :  { %v1160_v40 = vmax.f32 %v1152_v39, 0.0 }
 0x2bc   :  { %1168 = vst [vmem:[#allocation5 + $0x38] sm:$0xff] %v1160_v40 }
 0x2bd   :  { %1181 = dma.vmem_to_hbm [thread:$0]  %s1174_s14, 1024, %s1176_s15, [#allocation4], %s1329_s10, %s1329_s10, %s1330_s11  }
 0x2be   :  { %1326 = dma.done.wait [#allocation4], 1024  }
 0x2bf   :  { %1327 = vsyncadd [#allocation4], 4294966272 }
 0x2c0   :  { %1186 = vsyncpa [#allocation3], 1 }
 0x2c1   :  { %1187 = vsyncpa [#allocation4], 1 }

</bundles_post_ra>
